<compile_context>
chip_gen: v7x
topology: tpu7x:2x2x1
jax: 0.10.0
libtpu: 0.0.40
codegen_flags: <defaults>
</compile_context>

<pallas_src>
import jax
import jax.numpy as jnp
from jax import lax
from jax.experimental import pallas as pl
from jax.experimental.pallas import tpu as pltpu

C_IN  = 12            # 2500*3 + num_p = 7500
C1    = 32            # 3126
C2    = 24            # 2048
C3    = 16            # 1024
FC1   = 16            # 512
K_STN = 8             # 21  (fc2 emits K_STN*K_STN, orig 441)
K2    = K_STN * K_STN

# ---- packed weight slab (bf16, transposed + BN-scale folded) ----
# Row offsets are multiples of 16 (bf16 sublane packing) so every slice is
# tile-aligned.
W_ROW_W1, W_ROW_W2, W_ROW_W3, W_ROW_F1, W_ROW_F2 = 0, 32, 64, 80, 96
W_SLAB_ROWS = 160     # 96 + K2
W_SLAB_COLS = 128     # >= max C_in (=32), keeps one full lane tile

# ---- packed bias slab (f32, each bias replicated across all lanes) ----
B_ROW_1, B_ROW_2, B_ROW_3, B_ROW_4, B_ROW_5 = 0, 32, 56, 72, 88
B_SLAB_ROWS = 160


def _pack_weight_slab(p):
    def scaled_t(w, s=None):
        ws = w if s is None else w * s[None, :]   # fold BN scale in f32
        return ws.T                               # (C_out, C_in) f32

    mats = [
        (W_ROW_W1, scaled_t(p['c1_w'], p['bn1_s'])),   # (C1, C_IN)
        (W_ROW_W2, scaled_t(p['c2_w'], p['bn2_s'])),   # (C2, C1)
        (W_ROW_W3, scaled_t(p['c3_w'], p['bn3_s'])),   # (C3, C2)
        (W_ROW_F1, scaled_t(p['fc1_w'], p['bn4_s'])),  # (FC1, C3)
        (W_ROW_F2, scaled_t(p['fc2_w'])),              # (K2, FC1)
    ]
    slab = jnp.zeros((W_SLAB_ROWS, W_SLAB_COLS), jnp.float32)
    for r, m in mats:
        slab = slab.at[r:r + m.shape[0], :m.shape[1]].set(m)
    return slab.astype(jnp.bfloat16)


def _pack_bias_slab(p, cols):
    rows = [
        (B_ROW_1, p['bn1_b']),
        (B_ROW_2, p['bn2_b']),
        (B_ROW_3, p['bn3_b']),
        (B_ROW_4, p['bn4_b']),
        (B_ROW_5, p['fc2_b'] + jnp.eye(K_STN, dtype=jnp.float32).reshape(-1)),
    ]
    slab = jnp.zeros((B_SLAB_ROWS, cols), jnp.float32)
    for r, v in rows:
        slab = slab.at[r:r + v.shape[0], :].set(
            jnp.broadcast_to(v.reshape(-1, 1), (v.shape[0], cols)))
    return slab


def stn3d(x_bcn, params):
    """x_bcn: (B, C_IN, N) float32 (PyTorch NCW layout). Returns (B, K_STN, K_STN)."""
    B, C, N = x_bcn.shape
    assert C == C_IN

    # 2-step parallel grid when possible (one step per TensorCore on v7x);
    # odd batch sizes collapse to a single step.
    bt = B // 2 if (B % 2 == 0 and B >= 2) else B
    steps = B // bt

    b_cols = max(128, N)
    assert bt <= b_cols
    wslab = _pack_weight_slab(params)
    bslab = _pack_bias_slab(params, b_cols)

    def kernel(x_ref, w_ref, b_ref, out_ref):
        n = x_ref.shape[2]

        # Resident weight / bias tiles, loaded once per grid step (hoisted
        # out of the per-batch loop).
        w1  = w_ref[W_ROW_W1:W_ROW_W1 + C1, 0:C_IN]
        w2  = w_ref[W_ROW_W2:W_ROW_W2 + C2, 0:C1]
        w3  = w_ref[W_ROW_W3:W_ROW_W3 + C3, 0:C2]
        wf1 = w_ref[W_ROW_F1:W_ROW_F1 + FC1, 0:C3]
        wf2 = w_ref[W_ROW_F2:W_ROW_F2 + K2, 0:FC1]
        b1  = b_ref[B_ROW_1:B_ROW_1 + C1, 0:n]
        b2  = b_ref[B_ROW_2:B_ROW_2 + C2, 0:n]
        b3  = b_ref[B_ROW_3:B_ROW_3 + C3, 0:n]
        b4  = b_ref[B_ROW_4:B_ROW_4 + FC1, 0:bt]
        b5  = b_ref[B_ROW_5:B_ROW_5 + K2, 0:bt]

        def mm(w, h_bf16):
            return jnp.dot(w, h_bf16, preferred_element_type=jnp.float32)

        pooled = []
        for i in range(bt):
            h = x_ref[i].astype(jnp.bfloat16)                       # (C_IN, N)
            h = jnp.maximum(mm(w1, h) + b1, 0.0)                    # (C1, N)
            h = jnp.maximum(mm(w2, h.astype(jnp.bfloat16)) + b2, 0.0)   # (C2, N)
            h = jnp.maximum(mm(w3, h.astype(jnp.bfloat16)) + b3, 0.0)   # (C3, N)
            pooled.append(jnp.max(h, axis=1, keepdims=True))        # (C3, 1)

        g = pooled[0] if bt == 1 else jnp.concatenate(pooled, axis=1)   # (C3, bt)
        g = jnp.maximum(mm(wf1, g.astype(jnp.bfloat16)) + b4, 0.0)      # (FC1, bt)
        t = mm(wf2, g.astype(jnp.bfloat16)) + b5                        # (K2, bt)
        out_ref[0] = t

    out = pl.pallas_call(
        kernel,
        out_shape=jax.ShapeDtypeStruct((steps, K2, bt), jnp.float32),
        grid_spec=pltpu.PrefetchScalarGridSpec(
            num_scalar_prefetch=0,
            grid=(steps,),
            in_specs=[
                pl.BlockSpec((bt, C_IN, N), lambda i: (i, 0, 0)),           # x block
                pl.BlockSpec((W_SLAB_ROWS, W_SLAB_COLS), lambda i: (0, 0)),  # weights
                pl.BlockSpec((B_SLAB_ROWS, b_cols), lambda i: (0, 0)),       # biases
            ],
            out_specs=pl.BlockSpec((1, K2, bt), lambda i: (i, 0, 0)),
        ),
        compiler_params=pltpu.CompilerParams(
            dimension_semantics=("parallel",)),
    )(x_bcn, wslab, bslab)

    # (steps, K2, bt) -> (B, K2) -> (B, K_STN, K_STN); tiny host transpose.
    return out.transpose(0, 2, 1).reshape(B, K2).reshape(B, K_STN, K_STN)


# ------------------- deterministic parameter init -------------------
def _weight(key, c_in, c_out):
    return (jax.random.normal(key, (c_in, c_out), dtype=jnp.float32)
            * (1.0 / jnp.sqrt(c_in))).astype(jnp.float32)


def _fused_bn(key, c_out, eps=1e-5):
    k1, k2, k3, k4, k5 = jax.random.split(key, 5)
    conv_b = jax.random.normal(k1, (c_out,)) * 0.05
    gamma = jax.random.uniform(k2, (c_out,), minval=0.5, maxval=1.5)
    beta = jax.random.normal(k3, (c_out,)) * 0.1
    mean = jax.random.normal(k4, (c_out,)) * 0.1
    var = jax.random.uniform(k5, (c_out,), minval=0.5, maxval=1.5)
    scale = gamma / jnp.sqrt(var + eps)
    bias = scale * (conv_b - mean) + beta
    return scale.astype(jnp.float32), bias.astype(jnp.float32)


def init_params(key):
    keys = iter(jax.random.split(key, 16))
    p = {}

    def conv_bn(wname, bnname, cin, cout):
        p[wname] = _weight(next(keys), cin, cout)
        s, b = _fused_bn(next(keys), cout)
        p[bnname + '_s'] = s
        p[bnname + '_b'] = b

    conv_bn('c1_w', 'bn1', C_IN, C1)
    conv_bn('c2_w', 'bn2', C1, C2)
    conv_bn('c3_w', 'bn3', C2, C3)
    conv_bn('fc1_w', 'bn4', C3, FC1)
    p['fc2_w'] = _weight(next(keys), FC1, K2)
    p['fc2_b'] = (jax.random.normal(next(keys), (K2,)) * 0.05).astype(jnp.float32)
    return p


# ------------------- pure-JAX reference for correctness -------------------
def reference(x_bcn, p):
    hp = lax.Precision.HIGHEST
    bf = lambda a: a.astype(jnp.bfloat16).astype(jnp.float32)

    def conv_layer(h, w, s, b):
        ws = (w * s[None, :]).T                                 # fold scale in f32
        y = jnp.einsum('oc,bcn->bon', bf(ws), bf(h), precision=hp) + b[None, :, None]
        return jnp.maximum(y, 0.0)

    h = conv_layer(x_bcn, p['c1_w'], p['bn1_s'], p['bn1_b'])
    h = conv_layer(h, p['c2_w'], p['bn2_s'], p['bn2_b'])
    h = conv_layer(h, p['c3_w'], p['bn3_s'], p['bn3_b'])
    g = jnp.max(h, axis=2)                                      # (B, C3)
    wf1s = p['fc1_w'] * p['bn4_s'][None, :]
    g = jnp.maximum(
        jnp.einsum('bc,co->bo', bf(g), bf(wf1s), precision=hp) + p['bn4_b'][None, :],
        0.0)                                                    # (B, FC1)
    t = jnp.einsum('bc,co->bo', bf(g), bf(p['fc2_w']), precision=hp) + p['fc2_b'][None, :]
    t = t + jnp.eye(K_STN, dtype=jnp.float32).reshape(1, -1)
    return t.reshape(-1, K_STN, K_STN)


if __name__ == "__main__":
    B, N = 8, 128
    key = jax.random.PRNGKey(0)
    kx, kp = jax.random.split(key)
    x = jax.random.normal(kx, (B, C_IN, N), dtype=jnp.float32)
    params = init_params(kp)

    trans = stn3d(x, params)
    jax.block_until_ready(trans)

    trans_ref = reference(x, params)
    assert trans.shape == (B, K_STN, K_STN)
    assert jnp.allclose(trans, trans_ref, atol=2e-3, rtol=2e-3)
    print("KERNEL_OK")
</pallas_src>

<mosaic_0001>
module attributes {stable_mosaic.version = 11 : i64} {
  func.func @kernel(%arg0: i32, %arg1: memref<4x12x128xf32, #tpu.memory_space<vmem>>, %arg2: memref<160x128xbf16, #tpu.memory_space<vmem>>, %arg3: memref<160x128xf32, #tpu.memory_space<vmem>>, %arg4: memref<1x64x4xf32, #tpu.memory_space<vmem>>) attributes {dimension_semantics = [#tpu.dimension_semantics<parallel>], iteration_bounds = array<i64: 2>, scalar_prefetch = 0 : i64, scratch_operands = 0 : i64, tpu.core_type = #tpu.core_type<tc>, window_params = [{transform_indices = @transform_0, window_bounds = array<i64: 4, 12, 128>}, {pipeline_mode = #tpu.pipeline_mode<synchronous>, transform_indices = @transform_1, window_bounds = array<i64: 160, 128>}, {pipeline_mode = #tpu.pipeline_mode<synchronous>, transform_indices = @transform_2, window_bounds = array<i64: 160, 128>}, {transform_indices = @transform_3, window_bounds = array<i64: 1, 64, 4>}]} {
    %c0 = arith.constant 0 : index
    %c0_0 = arith.constant 0 : index
    %0 = vector.load %arg2[%c0, %c0_0] : memref<160x128xbf16, #tpu.memory_space<vmem>>, vector<32x12xbf16>
    %c32 = arith.constant 32 : index
    %c0_1 = arith.constant 0 : index
    %1 = vector.load %arg2[%c32, %c0_1] : memref<160x128xbf16, #tpu.memory_space<vmem>>, vector<24x32xbf16>
    %c64 = arith.constant 64 : index
    %c0_2 = arith.constant 0 : index
    %2 = vector.load %arg2[%c64, %c0_2] : memref<160x128xbf16, #tpu.memory_space<vmem>>, vector<16x24xbf16>
    %c80 = arith.constant 80 : index
    %c0_3 = arith.constant 0 : index
    %3 = vector.load %arg2[%c80, %c0_3] : memref<160x128xbf16, #tpu.memory_space<vmem>>, vector<16x16xbf16>
    %c96 = arith.constant 96 : index
    %c0_4 = arith.constant 0 : index
    %4 = vector.load %arg2[%c96, %c0_4] : memref<160x128xbf16, #tpu.memory_space<vmem>>, vector<64x16xbf16>
    %c0_5 = arith.constant 0 : index
    %c0_6 = arith.constant 0 : index
    %5 = vector.load %arg3[%c0_5, %c0_6] : memref<160x128xf32, #tpu.memory_space<vmem>>, vector<32x128xf32>
    %c32_7 = arith.constant 32 : index
    %c0_8 = arith.constant 0 : index
    %6 = vector.load %arg3[%c32_7, %c0_8] : memref<160x128xf32, #tpu.memory_space<vmem>>, vector<24x128xf32>
    %c56 = arith.constant 56 : index
    %c0_9 = arith.constant 0 : index
    %7 = vector.load %arg3[%c56, %c0_9] : memref<160x128xf32, #tpu.memory_space<vmem>>, vector<16x128xf32>
    %c72 = arith.constant 72 : index
    %c0_10 = arith.constant 0 : index
    %8 = vector.load %arg3[%c72, %c0_10] : memref<160x128xf32, #tpu.memory_space<vmem>>, vector<16x4xf32>
    %c88 = arith.constant 88 : index
    %c0_11 = arith.constant 0 : index
    %9 = vector.load %arg3[%c88, %c0_11] : memref<160x128xf32, #tpu.memory_space<vmem>>, vector<64x4xf32>
    %c0_12 = arith.constant 0 : index
    %c0_13 = arith.constant 0 : index
    %c0_14 = arith.constant 0 : index
    %10 = vector.load %arg1[%c0_12, %c0_13, %c0_14] : memref<4x12x128xf32, #tpu.memory_space<vmem>>, vector<1x12x128xf32>
    %11 = vector.shape_cast %10 : vector<1x12x128xf32> to vector<12x128xf32>
    %12 = arith.truncf %11 : vector<12x128xf32> to vector<12x128xbf16>
    %cst = arith.constant dense<0.000000e+00> : vector<32x128xf32>
    %13 = tpu.matmul %0, %12, %cst {dimension_numbers = #tpu.dot_dimension_numbers<[1], [0], [0], [1], [0, 0, 1, 1], [], []>} : vector<32x12xbf16>, vector<12x128xbf16>, vector<32x128xf32> -> vector<32x128xf32>
    %14 = arith.addf %13, %5 : vector<32x128xf32>
    %cst_15 = arith.constant 0.000000e+00 : f32
    %15 = vector.broadcast %cst_15 : f32 to vector<32x128xf32>
    %16 = arith.maximumf %14, %15 : vector<32x128xf32>
    %17 = arith.truncf %16 : vector<32x128xf32> to vector<32x128xbf16>
    %cst_16 = arith.constant dense<0.000000e+00> : vector<24x128xf32>
    %18 = tpu.matmul %1, %17, %cst_16 {dimension_numbers = #tpu.dot_dimension_numbers<[1], [0], [0], [1], [0, 0, 1, 1], [], []>} : vector<24x32xbf16>, vector<32x128xbf16>, vector<24x128xf32> -> vector<24x128xf32>
    %19 = arith.addf %18, %6 : vector<24x128xf32>
    %cst_17 = arith.constant 0.000000e+00 : f32
    %20 = vector.broadcast %cst_17 : f32 to vector<24x128xf32>
    %21 = arith.maximumf %19, %20 : vector<24x128xf32>
    %22 = arith.truncf %21 : vector<24x128xf32> to vector<24x128xbf16>
    %cst_18 = arith.constant dense<0.000000e+00> : vector<16x128xf32>
    %23 = tpu.matmul %2, %22, %cst_18 {dimension_numbers = #tpu.dot_dimension_numbers<[1], [0], [0], [1], [0, 0, 1, 1], [], []>} : vector<16x24xbf16>, vector<24x128xbf16>, vector<16x128xf32> -> vector<16x128xf32>
    %24 = arith.addf %23, %7 : vector<16x128xf32>
    %cst_19 = arith.constant 0.000000e+00 : f32
    %25 = vector.broadcast %cst_19 : f32 to vector<16x128xf32>
    %26 = arith.maximumf %24, %25 : vector<16x128xf32>
    %cst_20 = arith.constant dense<0xFF800000> : vector<16xf32>
    %27 = vector.multi_reduction <maximumf>, %26, %cst_20 [1] : vector<16x128xf32> to vector<16xf32>
    %28 = vector.shape_cast %27 : vector<16xf32> to vector<16x1xf32>
    %c1 = arith.constant 1 : index
    %c0_21 = arith.constant 0 : index
    %c0_22 = arith.constant 0 : index
    %29 = vector.load %arg1[%c1, %c0_21, %c0_22] : memref<4x12x128xf32, #tpu.memory_space<vmem>>, vector<1x12x128xf32>
    %30 = vector.shape_cast %29 : vector<1x12x128xf32> to vector<12x128xf32>
    %31 = arith.truncf %30 : vector<12x128xf32> to vector<12x128xbf16>
    %cst_23 = arith.constant dense<0.000000e+00> : vector<32x128xf32>
    %32 = tpu.matmul %0, %31, %cst_23 {dimension_numbers = #tpu.dot_dimension_numbers<[1], [0], [0], [1], [0, 0, 1, 1], [], []>} : vector<32x12xbf16>, vector<12x128xbf16>, vector<32x128xf32> -> vector<32x128xf32>
    %33 = arith.addf %32, %5 : vector<32x128xf32>
    %cst_24 = arith.constant 0.000000e+00 : f32
    %34 = vector.broadcast %cst_24 : f32 to vector<32x128xf32>
    %35 = arith.maximumf %33, %34 : vector<32x128xf32>
    %36 = arith.truncf %35 : vector<32x128xf32> to vector<32x128xbf16>
    %cst_25 = arith.constant dense<0.000000e+00> : vector<24x128xf32>
    %37 = tpu.matmul %1, %36, %cst_25 {dimension_numbers = #tpu.dot_dimension_numbers<[1], [0], [0], [1], [0, 0, 1, 1], [], []>} : vector<24x32xbf16>, vector<32x128xbf16>, vector<24x128xf32> -> vector<24x128xf32>
    %38 = arith.addf %37, %6 : vector<24x128xf32>
    %cst_26 = arith.constant 0.000000e+00 : f32
    %39 = vector.broadcast %cst_26 : f32 to vector<24x128xf32>
    %40 = arith.maximumf %38, %39 : vector<24x128xf32>
    %41 = arith.truncf %40 : vector<24x128xf32> to vector<24x128xbf16>
    %cst_27 = arith.constant dense<0.000000e+00> : vector<16x128xf32>
    %42 = tpu.matmul %2, %41, %cst_27 {dimension_numbers = #tpu.dot_dimension_numbers<[1], [0], [0], [1], [0, 0, 1, 1], [], []>} : vector<16x24xbf16>, vector<24x128xbf16>, vector<16x128xf32> -> vector<16x128xf32>
    %43 = arith.addf %42, %7 : vector<16x128xf32>
    %cst_28 = arith.constant 0.000000e+00 : f32
    %44 = vector.broadcast %cst_28 : f32 to vector<16x128xf32>
    %45 = arith.maximumf %43, %44 : vector<16x128xf32>
    %cst_29 = arith.constant dense<0xFF800000> : vector<16xf32>
    %46 = vector.multi_reduction <maximumf>, %45, %cst_29 [1] : vector<16x128xf32> to vector<16xf32>
    %47 = vector.shape_cast %46 : vector<16xf32> to vector<16x1xf32>
    %c2 = arith.constant 2 : index
    %c0_30 = arith.constant 0 : index
    %c0_31 = arith.constant 0 : index
    %48 = vector.load %arg1[%c2, %c0_30, %c0_31] : memref<4x12x128xf32, #tpu.memory_space<vmem>>, vector<1x12x128xf32>
    %49 = vector.shape_cast %48 : vector<1x12x128xf32> to vector<12x128xf32>
    %50 = arith.truncf %49 : vector<12x128xf32> to vector<12x128xbf16>
    %cst_32 = arith.constant dense<0.000000e+00> : vector<32x128xf32>
    %51 = tpu.matmul %0, %50, %cst_32 {dimension_numbers = #tpu.dot_dimension_numbers<[1], [0], [0], [1], [0, 0, 1, 1], [], []>} : vector<32x12xbf16>, vector<12x128xbf16>, vector<32x128xf32> -> vector<32x128xf32>
    %52 = arith.addf %51, %5 : vector<32x128xf32>
    %cst_33 = arith.constant 0.000000e+00 : f32
    %53 = vector.broadcast %cst_33 : f32 to vector<32x128xf32>
    %54 = arith.maximumf %52, %53 : vector<32x128xf32>
    %55 = arith.truncf %54 : vector<32x128xf32> to vector<32x128xbf16>
    %cst_34 = arith.constant dense<0.000000e+00> : vector<24x128xf32>
    %56 = tpu.matmul %1, %55, %cst_34 {dimension_numbers = #tpu.dot_dimension_numbers<[1], [0], [0], [1], [0, 0, 1, 1], [], []>} : vector<24x32xbf16>, vector<32x128xbf16>, vector<24x128xf32> -> vector<24x128xf32>
    %57 = arith.addf %56, %6 : vector<24x128xf32>
    %cst_35 = arith.constant 0.000000e+00 : f32
    %58 = vector.broadcast %cst_35 : f32 to vector<24x128xf32>
    %59 = arith.maximumf %57, %58 : vector<24x128xf32>
    %60 = arith.truncf %59 : vector<24x128xf32> to vector<24x128xbf16>
    %cst_36 = arith.constant dense<0.000000e+00> : vector<16x128xf32>
    %61 = tpu.matmul %2, %60, %cst_36 {dimension_numbers = #tpu.dot_dimension_numbers<[1], [0], [0], [1], [0, 0, 1, 1], [], []>} : vector<16x24xbf16>, vector<24x128xbf16>, vector<16x128xf32> -> vector<16x128xf32>
    %62 = arith.addf %61, %7 : vector<16x128xf32>
    %cst_37 = arith.constant 0.000000e+00 : f32
    %63 = vector.broadcast %cst_37 : f32 to vector<16x128xf32>
    %64 = arith.maximumf %62, %63 : vector<16x128xf32>
    %cst_38 = arith.constant dense<0xFF800000> : vector<16xf32>
    %65 = vector.multi_reduction <maximumf>, %64, %cst_38 [1] : vector<16x128xf32> to vector<16xf32>
    %66 = vector.shape_cast %65 : vector<16xf32> to vector<16x1xf32>
    %c3 = arith.constant 3 : index
    %c0_39 = arith.constant 0 : index
    %c0_40 = arith.constant 0 : index
    %67 = vector.load %arg1[%c3, %c0_39, %c0_40] : memref<4x12x128xf32, #tpu.memory_space<vmem>>, vector<1x12x128xf32>
    %68 = vector.shape_cast %67 : vector<1x12x128xf32> to vector<12x128xf32>
    %69 = arith.truncf %68 : vector<12x128xf32> to vector<12x128xbf16>
    %cst_41 = arith.constant dense<0.000000e+00> : vector<32x128xf32>
    %70 = tpu.matmul %0, %69, %cst_41 {dimension_numbers = #tpu.dot_dimension_numbers<[1], [0], [0], [1], [0, 0, 1, 1], [], []>} : vector<32x12xbf16>, vector<12x128xbf16>, vector<32x128xf32> -> vector<32x128xf32>
    %71 = arith.addf %70, %5 : vector<32x128xf32>
    %cst_42 = arith.constant 0.000000e+00 : f32
    %72 = vector.broadcast %cst_42 : f32 to vector<32x128xf32>
    %73 = arith.maximumf %71, %72 : vector<32x128xf32>
    %74 = arith.truncf %73 : vector<32x128xf32> to vector<32x128xbf16>
    %cst_43 = arith.constant dense<0.000000e+00> : vector<24x128xf32>
    %75 = tpu.matmul %1, %74, %cst_43 {dimension_numbers = #tpu.dot_dimension_numbers<[1], [0], [0], [1], [0, 0, 1, 1], [], []>} : vector<24x32xbf16>, vector<32x128xbf16>, vector<24x128xf32> -> vector<24x128xf32>
    %76 = arith.addf %75, %6 : vector<24x128xf32>
    %cst_44 = arith.constant 0.000000e+00 : f32
    %77 = vector.broadcast %cst_44 : f32 to vector<24x128xf32>
    %78 = arith.maximumf %76, %77 : vector<24x128xf32>
    %79 = arith.truncf %78 : vector<24x128xf32> to vector<24x128xbf16>
    %cst_45 = arith.constant dense<0.000000e+00> : vector<16x128xf32>
    %80 = tpu.matmul %2, %79, %cst_45 {dimension_numbers = #tpu.dot_dimension_numbers<[1], [0], [0], [1], [0, 0, 1, 1], [], []>} : vector<16x24xbf16>, vector<24x128xbf16>, vector<16x128xf32> -> vector<16x128xf32>
    %81 = arith.addf %80, %7 : vector<16x128xf32>
    %cst_46 = arith.constant 0.000000e+00 : f32
    %82 = vector.broadcast %cst_46 : f32 to vector<16x128xf32>
    %83 = arith.maximumf %81, %82 : vector<16x128xf32>
    %cst_47 = arith.constant dense<0xFF800000> : vector<16xf32>
    %84 = vector.multi_reduction <maximumf>, %83, %cst_47 [1] : vector<16x128xf32> to vector<16xf32>
    %85 = vector.shape_cast %84 : vector<16xf32> to vector<16x1xf32>
    %86 = tpu.concatenate %28, %47, %66, %85 in 1 : vector<16x1xf32>, vector<16x1xf32>, vector<16x1xf32>, vector<16x1xf32> -> vector<16x4xf32>
    %87 = arith.truncf %86 : vector<16x4xf32> to vector<16x4xbf16>
    %cst_48 = arith.constant dense<0.000000e+00> : vector<16x4xf32>
    %88 = tpu.matmul %3, %87, %cst_48 {dimension_numbers = #tpu.dot_dimension_numbers<[1], [0], [0], [1], [0, 0, 1, 1], [], []>} : vector<16x16xbf16>, vector<16x4xbf16>, vector<16x4xf32> -> vector<16x4xf32>
    %89 = arith.addf %88, %8 : vector<16x4xf32>
    %cst_49 = arith.constant 0.000000e+00 : f32
    %90 = vector.broadcast %cst_49 : f32 to vector<16x4xf32>
    %91 = arith.maximumf %89, %90 : vector<16x4xf32>
    %92 = arith.truncf %91 : vector<16x4xf32> to vector<16x4xbf16>
    %cst_50 = arith.constant dense<0.000000e+00> : vector<64x4xf32>
    %93 = tpu.matmul %4, %92, %cst_50 {dimension_numbers = #tpu.dot_dimension_numbers<[1], [0], [0], [1], [0, 0, 1, 1], [], []>} : vector<64x16xbf16>, vector<16x4xbf16>, vector<64x4xf32> -> vector<64x4xf32>
    %94 = arith.addf %93, %9 : vector<64x4xf32>
    %c0_51 = arith.constant 0 : index
    %c0_52 = arith.constant 0 : index
    %c0_53 = arith.constant 0 : index
    %95 = vector.load %arg4[%c0_51, %c0_52, %c0_53] : memref<1x64x4xf32, #tpu.memory_space<vmem>>, vector<1x64x4xf32>
    %96 = vector.shape_cast %95 : vector<1x64x4xf32> to vector<64x4xf32>
    %97 = vector.shape_cast %94 : vector<64x4xf32> to vector<1x64x4xf32>
    tpu.vector_store %arg4[%c0_51, %c0_52, %c0_53], %97 {strides = array<i32>} : memref<1x64x4xf32, #tpu.memory_space<vmem>>, vector<1x64x4xf32>,
    return
  }
  func.func @transform_0(%arg0: i32) -> (i32, i32, i32) {
    %c0_i32 = arith.constant 0 : i32
    %c0_i32_0 = arith.constant 0 : i32
    %c0_i32_1 = arith.constant 0 : i32
    return %arg0, %c0_i32, %c0_i32_0 : i32, i32, i32
  }
  func.func @transform_1(%arg0: i32) -> (i32, i32) {
    %c0_i32 = arith.constant 0 : i32
    %c0_i32_0 = arith.constant 0 : i32
    %c0_i32_1 = arith.constant 0 : i32
    return %c0_i32, %c0_i32_0 : i32, i32
  }
  func.func @transform_2(%arg0: i32) -> (i32, i32) {
    %c0_i32 = arith.constant 0 : i32
    %c0_i32_0 = arith.constant 0 : i32
    %c0_i32_1 = arith.constant 0 : i32
    return %c0_i32, %c0_i32_0 : i32, i32
  }
  func.func @transform_3(%arg0: i32) -> (i32, i32, i32) {
    %c0_i32 = arith.constant 0 : i32
    %c0_i32_0 = arith.constant 0 : i32
    %c0_i32_1 = arith.constant 0 : i32
    return %arg0, %c0_i32, %c0_i32_0 : i32, i32, i32
  }
}

</mosaic_0001>

<bundles_post_ra>
// kernel: tpu_custom_call.1
= control target key start
LH: loop header
LB: loop body
LE: loop exit
PB: predicated region body
PF: predicated region fallthrough
CT: control target
= control target key end

     0   :  { %8 = vsyncpa [#allocation3], 0  ;;  %s1478_s12 = smov 0   ;;  %s1760_s0 = inlined_call_operand.vmem [shape: f32[8,12,128], index: 0, kind: input, shape index: {}]   ;;  %s1761_s1 = inlined_call_operand.hbm [shape: bf16[160,128], index: 1, kind: input, shape index: {}]   ;;  %s1762_s2 = inlined_call_operand.vmem [shape: f32[160,128], index: 2, kind: input, shape index: {}]   ;;  %s1763_s3 = inlined_call_operand.vmem [shape: f32[2,64,4], index: 3, kind: output, shape index: {}]  }
   0x1 LB: > { %s1484_s13 = sadd.s32 4294967295, %s1451_s12   ;;  %p1170_p0 = scmp.ge.s32.totalorder %s1451_s12, 1  ;;  %s1451_s12 = sphi %s1478_s12, %s14_s12  }
   0x2   : > { %p113_p1 = scmp.lt.s32.totalorder %s1451_s12, 3  ;;  %s1453_s14 = smov [#allocation2]  }
   0x3   : > { %s125_s15 = sshll.u32 %s1453_s14, 4  ;;  %p1764_p3 = scmp.eq.s32.totalorder %s1484_s13, 0  ;;  %s126_s15 = int_to_ptr.vmem [resolvable:$true] %s125_s15 }
   0x4   : > { %p1488_p2 = pnand %p1170_p0, %p113_p1  ;;  %s1413_s20 = scalar_lea.hbm %s1761_s1, 1280 }
   0x5   : > { %p1414_p6 = scmp.ne.s32.totalorder %s1761_s1, %s1413_s20  ;;  %p1420_p10 = scmp.lt.u32.totalorder %s1413_s20, %s1761_s1 }
   0x6   : > { %s1766_s16 = scalar_select %p1488_p2, 1, 0 }
   0x7   : > { %p1384_p4 = pneg %p1488_p2 }
   0x9   : > { %p1497_p5 = pnand %p1764_p3, %p1384_p4 }
   0xb   : > { %p1415_p7 = pneg %p1497_p5 }
   0xd   : > { %p1416_p8 = pnand %p1415_p7, %p1414_p6 }
   0xf   : > { %p1417_p9 = pneg %p1416_p8 }
  0x11   : > { %p1422_p11 = pnand %p1420_p10, %p1417_p9 }
  0x13   : > { %1425 = shalt.err (!%p1422_p11)
}
  0x14   : > { %s1426_s25 = scalar_lea.vmem %s126_s15, 1280  ;;  %p1434_p1 = scmp.lt.s32.totalorder %s126_s15, %s126_s15 }
  0x15   : > { %p1427_p12 = scmp.ne.s32.totalorder %s126_s15, %s1426_s25  ;;  %p1435_p4 = scmp.lt.s32.totalorder %s1426_s25, %s1426_s25 }
  0x17   : > { %p1429_p13 = pnand %p1427_p12, %p1415_p7  ;;  %p1436_p3 = por %p1435_p4, %p1434_p1 }
  0x19   : > { %p1430_p0 = pneg %p1429_p13 }
  0x1b   : > { %p1437_p2 = pnand %p1436_p3, %p1430_p0 }
  0x1d   : > { %1440 = shalt.err (!%p1437_p2)
}
  0x1e   : > { %s1454_s26 = smov 64   ;;  %s1455_s27 = smov 4  }
  0x1f   : > { %1387 = dma.hbm_to_vmem [thread:$0]  (!%p1497_p5), %s1761_s1, 1280, %s126_s15, [#allocation3], %s1454_s26, %s1454_s26, %s1455_s27  }
  0x20   : > { %p1768_p6 = scmp.ne.s32.totalorder %s1766_s16, 0 }
  0x21   : > { %p1769_p8 = scmp.eq.s32.totalorder (!%p1768_p6), %s1484_s13, 0 }
  0x22   : > { %154 = sbr.rel (%p1768_p6) target bundleno = 2038 (0x7f6), region = 32 }
  0x29   : > { %1446 = dma.done.wait (%p1769_p8), [#allocation3], 1280   ;;  %p1770_p7 = pmov %p1769_p8 }
  0x2a   : > { %s1175_s30 = sshll.u32 %s1484_s13, 2  ;;  %vm250_vm0 = vcmask 1045504   ;;  %vm243_vm1 = vcmask 97280   ;;  %v1531_v3 = vld [vmem:[#allocation2] sm:$0xff]   ;;  %v1537_v5 = vld [vmem:[#allocation2 + $0x8] sm:$0xff]   ;;  %v1543_v6 = vld [vmem:[#allocation2 + $0x10] sm:$0xff]  }
  0x2b   : > { %1448 = vsyncadd (%p1770_p7), [#allocation3], 4294966016  ;;  %p180_p2 = scmp.lt.s32.totalorder %s1175_s30, 7  ;;  %1274 = vmatprep.mubr.msk.bf16.mxu0 %vm243_vm1, %v1531_v3  ;;  %1296 = vmatprep.mubr.msk.bf16.mxu1 %vm243_vm1, %v1531_v3  ;;  %vm317_vm2 = vcmask 261120   ;;  %v1556_v11 = vld [vmem:[%s1762_s2 + $0x10] sm:$0xff]  ;;  %v1561_v12 = vld [vmem:[%s1762_s2] sm:$0xff] }
  0x2c   : > { %v1566_v14 = vld [vmem:[%s1762_s2 + $0x18] sm:$0xff]  ;;  %v1572_v17 = vld [vmem:[%s1762_s2 + $0x8] sm:$0xff]  ;;  %v1456_v38 = vmov 0.0   ;;  %vm1457_vm3 = vmmov 0   ;;  %v1594_v45 = vld [vmem:[%s1762_s2 + $0x30] sm:$0xff]  ;;  %vm386_vm4 = vcmask 1043456  }
  0x2d   : > { %s1772_s30 = smov (!%p180_p2, %s1175_s30), 7  ;;  %v1577_v29 = vld [vmem:[#allocation2 + $0x18] ss:$0 sps:$4 sm:$0xff]   ;;  %v1599_v46 = vld [vmem:[%s1762_s2 + $0x20] sm:$0xff]  ;;  %v1605_v50 = vld [vmem:[%s1762_s2 + $0x28] sm:$0xff]  ;;  %vm382_vm5 = vcmask 195584  }
  0x2e   : > { %s1223_s4 = sshll.u32 %s1772_s30, 4  ;;  %v1611_v61 = vld [vmem:[#allocation2 + $0x20] sm:$0xff]   ;;  %vm932_vm6 = vcmask 7168   ;;  %vm935_vm7 = vcmask 15360   ;;  %vm938_vm8 = vcmask 23552   ;;  %vm947_vm9 = vcmask 130048  }
  0x2f   : > { %s1527_s7 = scalar_lea.vmem %s1760_s0, %s1223_s4  ;;  %p186_p3 = scmp.lt.s32.totalorder %s1484_s13, 1  ;;  %vm1092_vm10 = vcmask 31744  }
  0x30   : > { %v230_v0 = vld [vmem:[%s1527_s7] sm:$0xff]  ;;  %v231_v1 = vld [vmem:[%s1527_s7 + $0x8] sm:$0xf]  ;;  %v1190_v7 = vld [vmem:[%s1527_s7 + $0x10] sm:$0xff] }
  0x31   : > { %v232_v2 = vpack.c.bf16 %v231_v1, %v230_v0  ;;  %v1191_v8 = vld [vmem:[%s1527_s7 + $0x18] sm:$0xf]  ;;  %v1197_v62 = vld [vmem:[%s1527_s7 + $0x20] sm:$0xff]  ;;  %v1198_v63 = vld [vmem:[%s1527_s7 + $0x28] sm:$0xf]  ;;  %s1774_s13 = smov (!%p186_p3, %s1484_s13), 1 }
  0x32   : > { %v440_v9 = vpack.c.bf16 %v1191_v8, %v1190_v7  ;;  %v605_v0 = vpack.c.bf16 %v1198_v63, %v1197_v62  ;;  %v1638_v7 = vld [vmem:[%s1762_s2 + $0x40] sm:$0xff]  ;;  %s1224_s5 = sshll.u32 %s1774_s13, 6 }
  0x33   : > { %1376 = vmatprep.subr.msk.bf16.mxu0 %vm250_vm0, %v232_v2  ;;  %v252_v4 = vsel %vm250_vm0, %v232_v2, 0  ;;  %v1633_v2 = vld [vmem:[%s1762_s2 + $0x38] sm:$0xff]  ;;  %s1721_s14 = scalar_lea.vmem %s1763_s3, %s1224_s5 }
  0x34   : > { %1273 = vmatpush3.bf16.msra.mxu0 %v252_v4  ;;  %1377 = vmatprep.subr.msk.bf16.mxu1 %vm250_vm0, %v440_v9  ;;  %v442_v10 = vsel %vm250_vm0, %v440_v9, 0  ;;  %v607_v1 = vsel %vm250_vm0, %v605_v0, 0 }
  0x35   : > { %1295 = vmatpush3.bf16.msra.mxu1 %v442_v10 }
  0x36   : > { %1308 = vmatprep.subr.bf16.mxu1 %v1456_v38 }
  0x37   : > { %1275 = vmatmul.mubr.msk.bf16.vlgmr.msra.gmra.mrb[0].mxu0 %vm243_vm1, %v1537_v5 }
  0x38   : > { %1282 = vmatprep.mubr.msk.bf16.mxu0 %vm317_vm2, %v1543_v6  ;;  %1297 = vmatmul.mubr.msk.bf16.vlgmr.msra.gmra.mrb[0].mxu1 %vm243_vm1, %v1537_v5 }
  0x39   : > { %1312 = vmatprep.mubr.msk.bf16.mxu1 %vm1457_vm3, %v1456_v38 }
 0x10a   : > { %v1276_v13 = vpop.f32.mrb[0].mxu0 }
 0x10b   : > { %v297_v15 = vadd.f32 %v1276_v13, %v1556_v11  ;;  %v288_v16 = vpop.f32.mrb[1].mxu0  ;;  %v1298_v30 = vpop.f32.mrb[0].mxu1 }
 0x10c   : > { %v289_v18 = vadd.f32 %v288_v16, %v1561_v12  ;;  %v1277_v19 = vpop.f32.mrb[2].mxu0  ;;  %v478_v31 = vpop.f32.mrb[1].mxu1  ;;  %v487_v33 = vadd.f32 %v1298_v30, %v1556_v11 }
 0x10d   : > { %v300_v20 = vadd.f32 %v1277_v19, %v1566_v14  ;;  %v291_v21 = vpop.f32.mrb[3].mxu0  ;;  %v305_v23 = vmax.f32 %v297_v15, 0.0  ;;  %v1299_v32 = vpop.f32.mrb[2].mxu1  ;;  %v479_v34 = vadd.f32 %v478_v31, %v1561_v12 }
 0x10e   : > { %v292_v22 = vadd.f32 %v291_v21, %v1572_v17  ;;  %v303_v25 = vmax.f32 %v289_v18, 0.0  ;;  %v490_v35 = vadd.f32 %v1299_v32, %v1566_v14  ;;  %v481_v36 = vpop.f32.mrb[3].mxu1  ;;  %v495_v39 = vmax.f32 %v487_v33, 0.0 }
 0x10f   : > { %v306_v24 = vmax.f32 %v300_v20, 0.0  ;;  %v482_v37 = vadd.f32 %v481_v36, %v1572_v17  ;;  %v493_v40 = vmax.f32 %v479_v34, 0.0 }
 0x110   : > { %v304_v26 = vmax.f32 %v292_v22, 0.0  ;;  %v496_v41 = vmax.f32 %v490_v35, 0.0 }
 0x111   : > { %v308_v27 = vpack.c.bf16 %v306_v24, %v305_v23  ;;  %v494_v42 = vmax.f32 %v482_v37, 0.0 }
 0x112   : > { %v307_v28 = vpack.c.bf16 %v304_v26, %v303_v25  ;;  %v498_v43 = vpack.c.bf16 %v496_v41, %v495_v39 }
 0x113   : > { %v497_v44 = vpack.c.bf16 %v494_v42, %v493_v40 }
 0x114   : > { %1278 = vmatprep.subr.bf16.mxu0 %v307_v28 }
 0x115   : > { %1279 = vmatpush3.bf16.msra.mxu0 %v307_v28 }
 0x116   : > { %1280 = vmatprep.subr.bf16.mxu0 %v308_v27 }
 0x119   : > { %1281 = vmatpush3.bf16.msra.mxu0 %v308_v27 }
 0x11a   : > { %1286 = vmatprep.subr.bf16.mxu0 %v1456_v38 }
 0x11c   : > { %1283 = vmatmul.mubr.msk.bf16.vlgmr.msra.gmra.mrb[4].mxu0 %vm317_vm2, %v1577_v29 }
 0x11d   : > { %1290 = vmatprep.mubr.msk.bf16.mxu0 %vm1457_vm3, %v1456_v38 }
 0x1ef   : > { %v1284_v47 = vpop.f32.mrb[4].mxu0 }
 0x1f0   : > { %v367_v48 = vadd.f32 %v1284_v47, %v1594_v45  ;;  %v358_v49 = vpop.f32.mrb[5].mxu0 }
 0x1f1   : > { %v359_v51 = vadd.f32 %v358_v49, %v1599_v46  ;;  %v1285_v52 = vpop.f32.mrb[6].mxu0 }
 0x1f2   : > { %v361_v53 = vpop.f32.mrb[7].mxu0  ;;  %v374_v55 = vmax.f32 %v367_v48, 0.0  ;;  %v1205_v52 = vld [vmem:[%s1527_s7 + $0x38] sm:$0xf] }
 0x1f3   : > { %v362_v54 = vadd.f32 %v361_v53, %v1605_v50  ;;  %v372_v56 = vmax.f32 %v359_v51, 0.0  ;;  %v1204_v51 = vld [vmem:[%s1527_s7 + $0x30] sm:$0xff] }
 0x1f4   : > { %v376_v59 = vpack.c.bf16 %v374_v55, %v374_v55  ;;  %v770_v53 = vpack.c.bf16 %v1205_v52, %v1204_v51 }
 0x1f5   : > { %v373_v57 = vmax.f32 %v362_v54, 0.0 }
 0x1f6   : > { %v388_v60 = vsel %vm386_vm4, %v376_v59, 0  ;;  %v772_v54 = vsel %vm250_vm0, %v770_v53, 0 }
 0x1f7   : > { %v375_v58 = vpack.c.bf16 %v373_v57, %v372_v56 }
 0x1f9   : > { %1287 = vmatpush3.bf16.msra.mxu0 %v375_v58 }
 0x1fa   : > { %1288 = vmatprep.subr.bf16.mxu0 %v1456_v38 }
 0x1fd   : > { %1289 = vmatpush3.bf16.msra.mxu0 %v388_v60 }
 0x1fe   : > { %1300 = vmatprep.subr.bf16.mxu0 %v497_v44 }
 0x200   : > { %1291 = vmatmul.mubr.msk.bf16.vlgmr.msra.gmra.mrb[8].mxu0 %vm382_vm5, %v1611_v61 }
 0x201   : > { %1301 = vmatpush3.bf16.msra.mxu0 %v497_v44  ;;  %1304 = vmatprep.mubr.msk.bf16.mxu0 %vm317_vm2, %v1543_v6 }
 0x202   : > { %1302 = vmatprep.subr.bf16.mxu0 %v498_v43 }
 0x205   : > { %1303 = vmatpush3.bf16.msra.mxu0 %v498_v43 }
 0x206   : > { %1378 = vmatprep.subr.msk.bf16.mxu0 %vm250_vm0, %v605_v0 }
 0x208   : > { %1305 = vmatmul.mubr.msk.bf16.vlgmr.msra.gmra.mrb[12].mxu0 %vm317_vm2, %v1577_v29 }
 0x209   : > { %1317 = vmatpush3.bf16.msra.mxu0 %v607_v1  ;;  %1318 = vmatprep.mubr.msk.bf16.mxu0 %vm243_vm1, %v1531_v3 }
 0x20a   : > { %1330 = vmatprep.subr.bf16.mxu0 %v1456_v38 }
 0x210   : > { %1319 = vmatmul.mubr.msk.bf16.vlgmr.msra.gmra.mrb[16].mxu0 %vm243_vm1, %v1537_v5 }
 0x211   : > { %1334 = vmatprep.mubr.msk.bf16.mxu0 %vm1457_vm3, %v1456_v38 }
 0x2d3   : > { %v424_v4 = vpop.f32.mrb[8].mxu0 }
 0x2d4   : > { %v1292_v8 = vpop.f32.mrb[9].mxu0  ;;  %v425_v9 = vadd.f32 %v424_v4, %v1633_v2 }
 0x2d5   : > { %v427_v10 = vpop.f32.mrb[10].mxu0 }
 0x2d6   : > { %v428_v13 = vadd.f32 %v427_v10, %v1638_v7  ;;  %v1293_v15 = vpop.f32.mrb[11].mxu0  ;;  %v431_v16 = vmax.f32 %v425_v9, 0.0 }
 0x2d8   : > { %433 = vmax.xlane.f32.xlu0 %v431_v16  ;;  %v432_v18 = vmax.f32 %v428_v13, 0.0 }
 0x2db   : > { %v1306_v19 = vpop.f32.mrb[12].mxu0 }
 0x2dc   : > { %v542_v20 = vadd.f32 %v1306_v19, %v1594_v45  ;;  %435 = vmax.xlane.f32.xlu0 %v432_v18  ;;  %v533_v21 = vpop.f32.mrb[13].mxu0 }
 0x2dd   : > { %v534_v22 = vadd.f32 %v533_v21, %v1599_v46  ;;  %v1307_v23 = vpop.f32.mrb[14].mxu0 }
 0x2de   : > { %v536_v24 = vpop.f32.mrb[15].mxu0  ;;  %v549_v26 = vmax.f32 %v542_v20, 0.0 }
 0x2df   : > { %v537_v25 = vadd.f32 %v536_v24, %v1605_v50  ;;  %v547_v27 = vmax.f32 %v534_v22, 0.0 }
 0x2e0   : > { %v551_v32 = vpack.c.bf16 %v549_v26, %v549_v26 }
 0x2e1   : > { %v548_v28 = vmax.f32 %v537_v25, 0.0 }
 0x2e2   : > { %v553_v43 = vsel %vm386_vm4, %v551_v32, 0 }
 0x2e3   : > { %v550_v30 = vpack.c.bf16 %v548_v28, %v547_v27  ;;  %v1320_v31 = vpop.f32.mrb[16].mxu0 }
 0x2e4   : > { %v652_v33 = vadd.f32 %v1320_v31, %v1556_v11  ;;  %v643_v34 = vpop.f32.mrb[17].mxu0 }
 0x2e5   : > { %v644_v35 = vadd.f32 %v643_v34, %v1561_v12  ;;  %1309 = vmatpush3.bf16.msra.mxu1 %v550_v30  ;;  %v1321_v36 = vpop.f32.mrb[18].mxu0 }
 0x2e6   : > { %v655_v37 = vadd.f32 %v1321_v36, %v1566_v14  ;;  %v646_v39 = vpop.f32.mrb[19].mxu0  ;;  %1310 = vmatprep.subr.bf16.mxu1 %v1456_v38  ;;  %v660_v41 = vmax.f32 %v652_v33, 0.0 }
 0x2e7   : > { %v647_v40 = vadd.f32 %v646_v39, %v1572_v17  ;;  %v658_v44 = vmax.f32 %v644_v35, 0.0 }
 0x2e8   : > { %v661_v42 = vmax.f32 %v655_v37, 0.0 }
 0x2e9   : > { %v659_v47 = vmax.f32 %v647_v40, 0.0  ;;  %1311 = vmatpush3.bf16.msra.mxu1 %v553_v43 }
 0x2ea   : > { %v663_v48 = vpack.c.bf16 %v661_v42, %v660_v41 }
 0x2eb   : > { %v662_v49 = vpack.c.bf16 %v659_v47, %v658_v44 }
 0x2ec   : > { %1313 = vmatmul.mubr.msk.bf16.vlgmr.msra.gmra.mrb[4].mxu1 %vm382_vm5, %v1611_v61 }
 0x2ed   : > { %1322 = vmatprep.subr.bf16.mxu1 %v662_v49  ;;  %1326 = vmatprep.mubr.msk.bf16.mxu1 %vm317_vm2, %v1543_v6 }
 0x2ee   : > { %1323 = vmatpush3.bf16.msra.mxu1 %v662_v49 }
 0x2ef   : > { %1324 = vmatprep.subr.bf16.mxu1 %v663_v48 }
 0x2f2   : > { %1325 = vmatpush3.bf16.msra.mxu1 %v663_v48 }
 0x2f3   : > { %1379 = vmatprep.subr.msk.bf16.mxu1 %vm250_vm0, %v770_v53 }
 0x2f5   : > { %1327 = vmatmul.mubr.msk.bf16.vlgmr.msra.gmra.mrb[8].mxu1 %vm317_vm2, %v1577_v29 }
 0x2f6   : > { %1339 = vmatpush3.bf16.msra.mxu1 %v772_v54  ;;  %1340 = vmatprep.mubr.msk.bf16.mxu1 %vm243_vm1, %v1531_v3 }
 0x2f7   : > { %1352 = vmatprep.subr.bf16.mxu1 %v1456_v38 }
 0x2fd   : > { %1341 = vmatmul.mubr.msk.bf16.vlgmr.msra.gmra.mrb[12].mxu1 %vm243_vm1, %v1537_v5 }
 0x2fe   : > { %1356 = vmatprep.mubr.msk.bf16.mxu1 %vm1457_vm3, %v1456_v38 }
 0x3bf   : > { %v589_v55 = vpop.f32.mrb[4].mxu1 }
 0x3c0   : > { %v1314_v56 = vpop.f32.mrb[5].mxu1  ;;  %v590_v57 = vadd.f32 %v589_v55, %v1633_v2 }
 0x3c1   : > { %v592_v58 = vpop.f32.mrb[6].mxu1 }
 0x3c2   : > { %v593_v59 = vadd.f32 %v592_v58, %v1638_v7  ;;  %v1315_v60 = vpop.f32.mrb[7].mxu1  ;;  %v596_v62 = vmax.f32 %v590_v57, 0.0 }
 0x3c4   : > { %598 = vmax.xlane.f32.xlu1 %v596_v62  ;;  %v597_v63 = vmax.f32 %v593_v59, 0.0  ;;  %v434_v59 = vpop.xlane.xlu0 %433 }
 0x3c8   : > { %600 = vmax.xlane.f32.xlu1 %v597_v63  ;;  %v1328_v3 = vpop.f32.mrb[8].mxu1  ;;  %v436_v60 = vpop.xlane.xlu0 %435 }
 0x3c9   : > { %v707_v0 = vadd.f32 %v1328_v3, %v1594_v45  ;;  %v698_v1 = vpop.f32.mrb[9].mxu1 }
 0x3ca   : > { %v699_v5 = vadd.f32 %v698_v1, %v1599_v46  ;;  %v1329_v4 = vpop.f32.mrb[10].mxu1 }
 0x3cb   : > { %v701_v8 = vpop.f32.mrb[11].mxu1  ;;  %v714_v10 = vmax.f32 %v707_v0, 0.0 }
 0x3cc   : > { %v702_v9 = vadd.f32 %v701_v8, %v1605_v50  ;;  %v712_v13 = vmax.f32 %v699_v5, 0.0 }
 0x3cd   : > { %v716_v19 = vpack.c.bf16 %v714_v10, %v714_v10  ;;  %v1408_v10 = vld [vmem:[#allocation2 + $0x28] sm:$0xff]  }
 0x3ce   : > { %v713_v15 = vmax.f32 %v702_v9, 0.0 }
 0x3cf   : > { %v718_v30 = vsel %vm386_vm4, %v716_v19, 0 }
 0x3d0   : > { %v715_v16 = vpack.c.bf16 %v713_v15, %v712_v13  ;;  %v1342_v18 = vpop.f32.mrb[12].mxu1  ;;  %v1409_v13 = vld [vmem:[#allocation2 + $0x30] sm:$0xff]   ;;  %v220_v15 = vld [vmem:[%s1762_s2 + $0x48] sm:$0xff] }
 0x3d1   : > { %v817_v20 = vadd.f32 %v1342_v18, %v1556_v11  ;;  %v808_v21 = vpop.f32.mrb[13].mxu1  ;;  %v221_v18 = vld [vmem:[%s1762_s2 + $0x50] sm:$0xff] }
 0x3d2   : > { %v809_v22 = vadd.f32 %v808_v21, %v1561_v12  ;;  %1331 = vmatpush3.bf16.msra.mxu0 %v715_v16  ;;  %v1343_v23 = vpop.f32.mrb[14].mxu1 }
 0x3d3   : > { %v820_v24 = vadd.f32 %v1343_v23, %v1566_v14  ;;  %v811_v25 = vpop.f32.mrb[15].mxu1  ;;  %1332 = vmatprep.subr.bf16.mxu0 %v1456_v38  ;;  %v825_v27 = vmax.f32 %v817_v20, 0.0 }
 0x3d4   : > { %v812_v26 = vadd.f32 %v811_v25, %v1572_v17  ;;  %v823_v31 = vmax.f32 %v809_v22, 0.0 }
 0x3d5   : > { %v826_v28 = vmax.f32 %v820_v24, 0.0 }
 0x3d6   : > { %v824_v32 = vmax.f32 %v812_v26, 0.0  ;;  %1333 = vmatpush3.bf16.msra.mxu0 %v718_v30  ;;  %v1412_v30 = vld [vmem:[#allocation2 + $0x48] sm:$0xff]  }
 0x3d7   : > { %v828_v11 = vpack.c.bf16 %v826_v28, %v825_v27  ;;  %v1410_v27 = vld [vmem:[#allocation2 + $0x38] sm:$0xff]   ;;  %v1411_v28 = vld [vmem:[#allocation2 + $0x40] sm:$0xff]  }
 0x3d8   : > { %v827_v33 = vpack.c.bf16 %v824_v32, %v823_v31  ;;  %v224_v31 = vld [vmem:[%s1762_s2 + $0x68] sm:$0xff]  ;;  %v222_v32 = vld [vmem:[%s1762_s2 + $0x58] sm:$0xff] }
 0x3d9   : > { %1335 = vmatmul.mubr.msk.bf16.vlgmr.msra.gmra.mrb[20].mxu0 %vm382_vm5, %v1611_v61 }
 0x3da   : > { %1344 = vmatprep.subr.bf16.mxu0 %v827_v33  ;;  %1348 = vmatprep.mubr.msk.bf16.mxu0 %vm317_vm2, %v1543_v6 }
 0x3db   : > { %1345 = vmatpush3.bf16.msra.mxu0 %v827_v33  ;;  %v225_v33 = vld [vmem:[%s1762_s2 + $0x70] sm:$0xff] }
 0x3dc   : > { %1346 = vmatprep.subr.bf16.mxu0 %v828_v11 }
 0x3df   : > { %1347 = vmatpush3.bf16.msra.mxu0 %v828_v11 }
 0x3e0   : > { %1360 = vmatprep.subr.bf16.mxu0 %v1456_v38 }
 0x3e2   : > { %1349 = vmatmul.mubr.msk.bf16.vlgmr.msra.gmra.mrb[24].mxu0 %vm317_vm2, %v1577_v29 }
 0x3e3   : > { %1362 = vmatprep.mubr.msk.bf16.mxu0 %vm1457_vm3, %v1456_v38 }
 0x4ac   : > { %v754_v12 = vpop.f32.mrb[20].mxu0 }
 0x4ad   : > { %v755_v14 = vadd.f32 %v754_v12, %v1633_v2  ;;  %v1336_v17 = vpop.f32.mrb[21].mxu0 }
 0x4ae   : > { %v757_v34 = vpop.f32.mrb[22].mxu0  ;;  %v223_v17 = vld [vmem:[%s1762_s2 + $0x60] sm:$0xff] }
 0x4af   : > { %v761_v35 = vmax.f32 %v755_v14, 0.0  ;;  %v758_v36 = vadd.f32 %v757_v34, %v1638_v7  ;;  %v1337_v6 = vpop.f32.mrb[23].mxu0 }
 0x4b1   : > { %v762_v37 = vmax.f32 %v758_v36, 0.0  ;;  %763 = vmax.xlane.f32.xlu0 %v761_v35 }
 0x4b3   : > { %765 = vmax.xlane.f32.xlu1 %v762_v37 }
 0x4b5   : > { %v1350_v39 = vpop.f32.mrb[24].mxu0 }
 0x4b6   : > { %v872_v40 = vadd.f32 %v1350_v39, %v1594_v45  ;;  %v863_v41 = vpop.f32.mrb[25].mxu0  ;;  %v228_v39 = vld [vmem:[%s1762_s2 + $0x88] sm:$0xff] }
 0x4b7   : > { %v864_v29 = vadd.f32 %v863_v41, %v1599_v46  ;;  %v1351_v42 = vpop.f32.mrb[26].mxu0 }
 0x4b8   : > { %v866_v43 = vpop.f32.mrb[27].mxu0  ;;  %v879_v47 = vmax.f32 %v872_v40, 0.0  ;;  %v226_v40 = vld [vmem:[%s1762_s2 + $0x78] sm:$0xff] }
 0x4b9   : > { %v867_v44 = vadd.f32 %v866_v43, %v1605_v50  ;;  %v877_v48 = vmax.f32 %v864_v29, 0.0  ;;  %v229_v29 = vld [vmem:[%s1762_s2 + $0x90] sm:$0xff] }
 0x4ba   : > { %v881_v52 = vpack.c.bf16 %v879_v47, %v879_v47 }
 0x4bb   : > { %v878_v49 = vmax.f32 %v867_v44, 0.0  ;;  %v227_v44 = vld [vmem:[%s1762_s2 + $0x80] sm:$0xff] }
 0x4bc   : > { %v883_v53 = vsel %vm386_vm4, %v881_v52, 0 }
 0x4bd   : > { %v880_v51 = vpack.c.bf16 %v878_v49, %v877_v48 }
 0x4bf   : > { %1353 = vmatpush3.bf16.msra.mxu1 %v880_v51 }
 0x4c0   : > { %1354 = vmatprep.subr.bf16.mxu1 %v1456_v38  ;;  %v599_v38 = vpop.xlane.xlu1 %598 }
 0x4c3   : > { %1355 = vmatpush3.bf16.msra.mxu1 %v883_v53 }
 0x4c4   : > { %v601_v62 = vpop.xlane.xlu1 %600 }
 0x4c5   : > { %v934_v0 = vsel %vm932_vm6, %v436_v60, %v601_v62 }
 0x4c6   : > { %1357 = vmatmul.mubr.msk.bf16.vlgmr.msra.gmra.mrb[16].mxu1 %vm382_vm5, %v1611_v61 }
 0x4c7   : > { %1368 = vmatprep.mubr.msk.bf16.mxu1 %vm947_vm9, %v1409_v13 }
 0x53e   : > { %v764_v63 = vpop.xlane.xlu0 %763 }
 0x540   : > { %v766_v3 = vpop.xlane.xlu1 %765 }
 0x541   : > { %v937_v5 = vsel %vm935_vm7, %v934_v0, %v766_v3 }
 0x599   : > { %v919_v45 = vpop.f32.mrb[16].mxu1 }
 0x59a   : > { %v920_v46 = vadd.f32 %v919_v45, %v1633_v2  ;;  %v1358_v54 = vpop.f32.mrb[17].mxu1  ;;  %v933_v2 = vsel %vm932_vm6, %v434_v59, %v599_v38 }
 0x59b   : > { %v922_v55 = vpop.f32.mrb[18].mxu1  ;;  %v936_v1 = vsel %vm935_vm7, %v933_v2, %v764_v63 }
 0x59c   : > { %v926_v50 = vmax.f32 %v920_v46, 0.0  ;;  %v923_v56 = vadd.f32 %v922_v55, %v1638_v7  ;;  %v1359_v57 = vpop.f32.mrb[19].mxu1 }
 0x59e   : > { %v927_v58 = vmax.f32 %v923_v56, 0.0  ;;  %928 = vmax.xlane.f32.xlu0 %v926_v50 }
 0x5a0   : > { %930 = vmax.xlane.f32.xlu1 %v927_v58 }
 0x62b   : > { %v929_v61 = vpop.xlane.xlu0 %928 }
 0x62c   : > { %v939_v7 = vsel %vm938_vm8, %v936_v1, %v929_v61 }
 0x62d   : > { %v931_v4 = vpop.xlane.xlu1 %930 }
 0x62e   : > { %v940_v8 = vsel %vm938_vm8, %v937_v5, %v931_v4 }
 0x62f   : > { %v941_v9 = vpack.c.bf16 %v940_v8, %v939_v7 }
 0x631   : > { %1361 = vmatpush3.bf16.msra.mxu0 %v941_v9 }
 0x634   : > { %1363 = vmatmul.mubr.msk.bf16.vlgmr.msra.gmra.mrb[28].mxu0 %vm947_vm9, %v1408_v10 }
 0x707   : > { %v985_v16 = vpop.f32.mrb[28].mxu0 }
 0x708   : > { %v986_v19 = vadd.f32 %v985_v16, %v220_v15  ;;  %v1364_v20 = vpop.f32.mrb[29].mxu0 }
 0x709   : > { %v988_v21 = vpop.f32.mrb[30].mxu0 }
 0x70a   : > { %v989_v22 = vadd.f32 %v988_v21, %v221_v18  ;;  %v1365_v23 = vpop.f32.mrb[31].mxu0  ;;  %v992_v24 = vmax.f32 %v986_v19, 0.0 }
 0x70c   : > { %v993_v25 = vmax.f32 %v989_v22, 0.0 }
 0x70e   : > { %v994_v26 = vpack.c.bf16 %v993_v25, %v992_v24 }
 0x710   : > { %1366 = vmatprep.subr.bf16.mxu1 %v994_v26 }
 0x711   : > { %1367 = vmatpush3.bf16.msra.mxu1 %v994_v26 }
 0x714   : > { %1369 = vmatmul.mubr.msk.bf16.vlgmr.msra.gmra.mrb[20].mxu1 %vm947_vm9, %v1410_v27 }
 0x715   : > { %1372 = vmatprep.mubr.msk.bf16.mxu1 %vm947_vm9, %v1411_v28 }
 0x71c   : > { %1373 = vmatmul.mubr.msk.bf16.gmra.mrb[24].mxu1 %vm947_vm9, %v1412_v30 }
 0x7e7   : > { %v1370_v11 = vpop.f32.mrb[20].mxu1 }
 0x7e8   : > { %v1070_v12 = vadd.f32 %v1370_v11, %v224_v31  ;;  %v1061_v14 = vpop.f32.mrb[21].mxu1 }
 0x7e9   : > { %v1062_v34 = vadd.f32 %v1061_v14, %v222_v32  ;;  %v1371_v35 = vpop.f32.mrb[22].mxu1 }
 0x7ea   : > { %1095 = vst.msk [vmem:[%s1721_s14 + $0x10] sm:$0xff] %vm1092_vm10, %v1070_v12  ;;  %v1073_v36 = vadd.f32 %v1371_v35, %v225_v33  ;;  %v1064_v6 = vpop.f32.mrb[23].mxu1 }
 0x7eb   : > { %1093 = vst.msk [vmem:[%s1721_s14] sm:$0xff] %vm1092_vm10, %v1062_v34  ;;  %v1065_v37 = vadd.f32 %v1064_v6, %v223_v17 }
 0x7ec   : > { %1096 = vst.msk [vmem:[%s1721_s14 + $0x18] sm:$0xff] %vm1092_vm10, %v1073_v36 }
 0x7ed   : > { %1094 = vst.msk [vmem:[%s1721_s14 + $0x8] sm:$0xff] %vm1092_vm10, %v1065_v37 }
 0x7ef   : > { %v1374_v41 = vpop.f32.mrb[24].mxu1 }
 0x7f0   : > { %v1086_v42 = vadd.f32 %v1374_v41, %v228_v39  ;;  %v1077_v43 = vpop.f32.mrb[25].mxu1 }
 0x7f1   : > { %v1078_v47 = vadd.f32 %v1077_v43, %v226_v40  ;;  %v1375_v48 = vpop.f32.mrb[26].mxu1 }
 0x7f2   : > { %1099 = vst.msk [vmem:[%s1721_s14 + $0x30] sm:$0xff] %vm1092_vm10, %v1086_v42  ;;  %v1089_v49 = vadd.f32 %v1375_v48, %v229_v29  ;;  %v1080_v51 = vpop.f32.mrb[27].mxu1 }
 0x7f3   : > { %1097 = vst.msk [vmem:[%s1721_s14 + $0x20] sm:$0xff] %vm1092_vm10, %v1078_v47  ;;  %v1081_v52 = vadd.f32 %v1080_v51, %v227_v44 }
 0x7f4   : > { %1100 = vst.msk [vmem:[%s1721_s14 + $0x38] sm:$0xff] %vm1092_vm10, %v1089_v49 }
 0x7f5   : > { %1098 = vst.msk [vmem:[%s1721_s14 + $0x28] sm:$0xff] %vm1092_vm10, %v1081_v52 }
 0x7f6 PF: > { %s14_s12 = sadd.s32 1, %s1451_s12  }
 0x7f7   : > { %p11_p5 = scmp.ge.s32.totalorder %s14_s12, 4  }
 0x7f9   :  { %13 = sbr.rel (!%p11_p5) target bundleno = 1 (0x1), region = 70 }
 0x800   :  { %1122 = vsyncpa [#allocation3], 1 }
 0x801   :  { %1124 = vsyncpa [#allocation3 + $0x1], 1 }

</bundles_post_ra>
